<compile_context>
chip_gen: v6e
topology: v6e:2x2x1
jax: 0.10.0
libtpu: 0.0.40
codegen_flags: <defaults>
</compile_context>

<pallas_src>
import math
import functools

import jax
import jax.numpy as jnp
from jax.experimental import pallas as pl
from jax.experimental.pallas import tpu as pltpu


# ---------------------------------------------------------------------------
# Kernel
# ---------------------------------------------------------------------------
def _pe_add_dropout_kernel(seed_ref, x_ref, pe_ref, o_ref, *, dropout_p, training):
    # x_ref/o_ref : (tile_S, B, D) VMEM tiles; pe_ref : (tile_S, 1, D).
    # Broadcasting the size-1 batch dim is a cheap sublane broadcast and is
    # fully hidden under the HBM DMA shadow (kernel is bandwidth-bound).
    y = x_ref[...] + pe_ref[...]

    if training and dropout_p > 0.0:
        keep = 1.0 - dropout_p
        if keep <= 0.0:
            y = jnp.zeros_like(y)
        else:
            # Per-tile seed: each grid step draws an independent random stream.
            pltpu.prng_seed(seed_ref[0], pl.program_id(0))
            bits = pltpu.prng_random_bits(y.shape)
            if bits.dtype != jnp.uint32:
                bits = pltpu.bitcast(bits, jnp.uint32)
            # keep iff bits < keep * 2^32  (single uint compare, no float convert)
            thr = min(int(round(keep * 4294967296.0)), 4294967295)
            mask = bits < jnp.uint32(thr)
            inv_keep = 1.0 / keep  # folded Python constant -> single vmul
            y = jnp.where(mask, y * inv_keep, jnp.zeros_like(y))

    o_ref[...] = y.astype(o_ref.dtype)


def _choose_tile_s(S, B, D, itemsize):
    """Sequence-tile size.

    VMEM accounting: x/out blocks are (tile_S, B, D) with B sublane-padded to
    a multiple of 8; the pe block is (tile_S, 1, D) padded 1->8.  With double
    buffering the total is 2 * tile_S * D * itemsize * (2*B_pad + 8); target
    ~24 MiB (fits v6e/v7x 32 MiB scoped default; v5e gets vmem_limit_bytes).
    Also cap so the grid keeps >= 2 tiles for megacore sharding on v7x.
    """
    b_pad = ((max(B, 1) + 7) // 8) * 8
    per_row_bytes = (2 * b_pad + 8) * D * itemsize          # x + out + pe (padded)
    tile_s = max(1, (12 * 1024 * 1024) // max(1, per_row_bytes))  # x2 buffers ~ 24 MiB
    if S >= 2:
        tile_s = min(tile_s, -(-S // 2))                     # >= 2 grid tiles
    tile_s = min(tile_s, S)
    if tile_s >= 8:
        tile_s -= tile_s % 8                                 # clean sublane-group boundary
    return max(1, tile_s)


# ---------------------------------------------------------------------------
# Module-equivalent wrapper
# ---------------------------------------------------------------------------
class PositionalEncoding:
    def __init__(self, d_model, dropout=0.1, max_len=5000):
        self.d_model = int(d_model)
        self.dropout_p = float(dropout)
        # Same formula as the PyTorch module.
        position = jnp.arange(max_len, dtype=jnp.float32)[:, None]              # (max_len, 1)
        div_term = jnp.exp(
            jnp.arange(0, d_model, 2, dtype=jnp.float32) * (-math.log(10000.0) / d_model)
        )                                                                        # (d_model//2,)
        pe = jnp.zeros((max_len, d_model), dtype=jnp.float32)
        pe = pe.at[:, 0::2].set(jnp.sin(position * div_term))
        pe = pe.at[:, 1::2].set(jnp.cos(position * div_term))
        self.pe = pe[:, None, :]                # (max_len, 1, d_model) — PyTorch buffer layout
        self._pe_cache = {}                     # (S, dtype) -> small (S, 1, D) slice

    def __call__(self, x, *, training=False, seed=0):
        # x: (S, B, D) — PyTorch seq-first convention.
        S, B, D = x.shape
        assert D == self.d_model

        # Small (S, 1, D) table slice in the activation dtype (bf16 stays bf16).
        cache_key = (S, str(jnp.dtype(x.dtype)))
        pe_slab = self._pe_cache.get(cache_key)
        if pe_slab is None:
            pe_slab = self.pe[:S].astype(x.dtype)            # (S, 1, D) — tiny
            self._pe_cache[cache_key] = pe_slab

        itemsize = jnp.dtype(x.dtype).itemsize
        tile_s = _choose_tile_s(S, B, D, itemsize)
        grid = (pl.cdiv(S, tile_s),)

        seed_arr = jnp.asarray([seed], dtype=jnp.int32)
        kernel = functools.partial(
            _pe_add_dropout_kernel, dropout_p=self.dropout_p, training=training
        )

        out = pl.pallas_call(
            kernel,
            out_shape=jax.ShapeDtypeStruct((S, B, D), x.dtype),
            grid_spec=pltpu.PrefetchScalarGridSpec(
                num_scalar_prefetch=1,          # seed scalar -> SMEM
                grid=grid,
                in_specs=[
                    pl.BlockSpec((tile_s, B, D), lambda i, seed: (i, 0, 0)),   # x
                    pl.BlockSpec((tile_s, 1, D), lambda i, seed: (i, 0, 0)),   # pe (S,1,D)
                ],
                out_specs=pl.BlockSpec((tile_s, B, D), lambda i, seed: (i, 0, 0)),
            ),
            compiler_params=pltpu.CompilerParams(
                dimension_semantics=("parallel",),     # shard seq tiles across v7x's 2 TCs
                vmem_limit_bytes=32 * 1024 * 1024,     # raise v5e's 16 MiB scoped default
            ),
        )(seed_arr, x, pe_slab)
        return out


# ---------------------------------------------------------------------------
# Test
# ---------------------------------------------------------------------------
if __name__ == "__main__":
    S, B, D = 8, 2, 32
    key = jax.random.PRNGKey(0)
    x = jax.random.normal(key, (S, B, D), dtype=jnp.float32)

    mod = PositionalEncoding(d_model=D, dropout=0.1, max_len=5000)

    # Eval mode (dropout = identity) — deterministic, check against pure-JAX ref.
    y = jax.block_until_ready(mod(x, training=False))
    y_ref = x + mod.pe[:S]
    assert y.shape == (S, B, D)
    assert jnp.allclose(y, y_ref, atol=1e-6, rtol=1e-6), "mismatch vs reference"

    # TODO(synk): pltpu.prng_* has no CPU-interpret lowering; the training-mode
    # dropout path is only exercised when running on a real TPU backend.
    if jax.default_backend() == "tpu":
        y_train = jax.block_until_ready(mod(x, training=True, seed=123))
        assert y_train.shape == (S, B, D)
        keep = 1.0 - mod.dropout_p
        scaled = y_ref / keep
        ok = (jnp.abs(y_train) <= 1e-6) | (
            jnp.abs(y_train - scaled) <= 1e-4 + 1e-4 * jnp.abs(scaled)
        )
        assert bool(jnp.all(ok)), "dropout output not in {0, (x+pe)/keep}"

    print("KERNEL_OK")
</pallas_src>

<mosaic_0001>
module attributes {stable_mosaic.version = 11 : i64} {
  func.func @_pe_add_dropout_kernel(%arg0: i32, %arg1: memref<1xi32, #tpu.memory_space<smem>>, %arg2: memref<4x2x32xf32, #tpu.memory_space<vmem>>, %arg3: memref<4x1x32xf32, #tpu.memory_space<vmem>>, %arg4: memref<4x2x32xf32, #tpu.memory_space<vmem>>) attributes {dimension_semantics = [#tpu.dimension_semantics<parallel>], iteration_bounds = array<i64: 2>, scalar_prefetch = 1 : i64, scratch_operands = 0 : i64, tpu.core_type = #tpu.core_type<tc>, window_params = [{transform_indices = @transform_0, window_bounds = array<i64: 4, 2, 32>}, {transform_indices = @transform_1, window_bounds = array<i64: 4, 1, 32>}, {transform_indices = @transform_2, window_bounds = array<i64: 4, 2, 32>}]} {
    %c0 = arith.constant 0 : index
    %c0_0 = arith.constant 0 : index
    %c0_1 = arith.constant 0 : index
    %0 = vector.load %arg2[%c0, %c0_0, %c0_1] : memref<4x2x32xf32, #tpu.memory_space<vmem>>, vector<4x2x32xf32>
    %c0_2 = arith.constant 0 : index
    %c0_3 = arith.constant 0 : index
    %c0_4 = arith.constant 0 : index
    %1 = vector.load %arg3[%c0_2, %c0_3, %c0_4] : memref<4x1x32xf32, #tpu.memory_space<vmem>>, vector<4x1x32xf32>
    %2 = vector.broadcast %1 : vector<4x1x32xf32> to vector<4x2x32xf32>
    %3 = arith.addf %0, %2 : vector<4x2x32xf32>
    %c0_5 = arith.constant 0 : index
    %c0_6 = arith.constant 0 : index
    %c0_7 = arith.constant 0 : index
    %4 = vector.load %arg4[%c0_5, %c0_6, %c0_7] : memref<4x2x32xf32, #tpu.memory_space<vmem>>, vector<4x2x32xf32>
    tpu.vector_store %arg4[%c0_5, %c0_6, %c0_7], %3 {strides = array<i32>} : memref<4x2x32xf32, #tpu.memory_space<vmem>>, vector<4x2x32xf32>,
    return
  }
  func.func @transform_0(%arg0: i32, %arg1: memref<1xi32, #tpu.memory_space<smem>>) -> (i32, i32, i32) {
    %c0_i32 = arith.constant 0 : i32
    %c0_i32_0 = arith.constant 0 : i32
    %c0_i32_1 = arith.constant 0 : i32
    return %arg0, %c0_i32, %c0_i32_0 : i32, i32, i32
  }
  func.func @transform_1(%arg0: i32, %arg1: memref<1xi32, #tpu.memory_space<smem>>) -> (i32, i32, i32) {
    %c0_i32 = arith.constant 0 : i32
    %c0_i32_0 = arith.constant 0 : i32
    %c0_i32_1 = arith.constant 0 : i32
    return %arg0, %c0_i32, %c0_i32_0 : i32, i32, i32
  }
  func.func @transform_2(%arg0: i32, %arg1: memref<1xi32, #tpu.memory_space<smem>>) -> (i32, i32, i32) {
    %c0_i32 = arith.constant 0 : i32
    %c0_i32_0 = arith.constant 0 : i32
    %c0_i32_1 = arith.constant 0 : i32
    return %arg0, %c0_i32, %c0_i32_0 : i32, i32, i32
  }
}

</mosaic_0001>

<bundles_post_ra>
// kernel: tpu_custom_call.1
= control target key start
LH: loop header
LB: loop body
LE: loop exit
PB: predicated region body
PF: predicated region fallthrough
CT: control target
= control target key end

     0   :  { %9 = vsyncpa [#allocation5], 0  ;;  %s808_s0 = inlined_call_operand.<no memory space> [shape: s32[1], index: 0, kind: input, shape index: {}]   ;;  %s809_s1 = inlined_call_operand.hbm [shape: f32[8,2,32], index: 1, kind: input, shape index: {}]   ;;  %s810_s2 = inlined_call_operand.hbm [shape: f32[8,1,32], index: 2, kind: input, shape index: {}]   ;;  %s811_s3 = inlined_call_operand.hbm [shape: f32[8,2,32], index: 3, kind: output, shape index: {}]  }
   0x1   :  { %11 = vsyncpa [#allocation5 + $0x1], 0 }
   0x2   :  { %12 = vsyncpa [#allocation8], 0 }
   0x3   :  { %14 = vsyncpa [#allocation8 + $0x1], 0 }
   0x4   :  { %15 = vsyncpa [#allocation6], 0 }
   0x5   :  { %17 = vsyncpa [#allocation6 + $0x1], 0  ;;  %s595_s12 = smov 0   ;;  %s597_s13 = smov 0  }
   0x6   :  { %s599_s0 = smov 0   ;;  %s601_s14 = smov 0  }
   0x7 LB: > { %s616_s15 = sadd.s32 4294967295, %s564_s14   ;;  %s358_s16 = sadd.s32 4294967294, %s564_s14   ;;  %s564_s14 = sphi %s601_s14, %s827_s14   ;;  %s560_s0 = sphi %s599_s0, %s826_s0   ;;  %s556_s13 = sphi %s597_s13, %s825_s13   ;;  %s552_s12 = sphi %s595_s12, %s824_s12  }
   0x8   : > { %s620_s17 = sadd.s32 1, %s564_s14   ;;  %s30_s18 = sadd.s32 1, %s560_s0 }
   0x9   : > { %s27_s19 = ssub.s32 %s564_s14, %s620_s17  ;;  %p37_p0 = scmp.ne.s32.totalorder %s560_s0, %s556_s13 }
   0xa   : > { %p28_p1 = scmp.eq.s32.totalorder %s27_s19, 0  ;;  %p38_p2 = scmp.eq.s32.totalorder %s564_s14, 0 }
   0xb   : > { %p43_p3 = scmp.ne.s32.totalorder %s556_s13, %s552_s12  ;;  %p44_p4 = scmp.eq.s32.totalorder %s616_s15, 0 }
   0xc   : > { %s632_s20 = scalar_select %p28_p1, %s560_s0, %s30_s18  }
   0xd   : > { %p634_p5 = por %p38_p2, %p37_p0  ;;  %p638_p6 = por %p44_p4, %p43_p3 }
   0xe   : > { %p93_p7 = scmp.eq.s32.totalorder %s616_s15, 1  ;;  %p99_p8 = scmp.eq.s32.totalorder %s358_s16, 1 }
   0xf   : > { %s815_s22 = scalar_select %p638_p6, 1, 0 }
  0x10   : > { %p400_p10 = scmp.lt.s32.totalorder %s564_s14, 2  ;;  %p645_p11 = por %p93_p7, %p37_p0 }
  0x11   : > { %p649_p12 = por %p99_p8, %p43_p3  ;;  %s654_s25 = sand.u32 1, %s560_s0  }
  0x12   : > { %s816_s23 = scalar_select %p645_p11, 1, 0 }
  0x13   : > { %s817_s24 = scalar_select %p649_p12, 1, 0 }
  0x14   : > { %s380_s26 = sshll.u32 %s564_s14, 7  ;;  %s361_s27 = sshll.u32 %s654_s25, 3 }
  0x15   : > { %s661_s30 = scalar_lea.hbm %s809_s1, %s380_s26  ;;  %s123_s4 = scalar_lea.vmem [#allocation4], %s361_s27 }
  0x16   : > { %s130_s5 = sshll.u32 %s123_s4, 4  ;;  %p665_p13 = pnand %p400_p10, %p634_p5  ;;  %s669_s5 = int_to_ptr.vmem [resolvable:$true] %s130_s5 }
  0x17   : > { %s120_s7 = scalar_lea.sflag [#allocation5], %s654_s25  ;;  %s440_s8 = scalar_lea.hbm %s661_s30, 128 }
  0x18   : > { %p441_p0 = scmp.ne.s32.totalorder %s661_s30, %s440_s8  ;;  %p442_p1 = pneg %p665_p13 }
  0x19   : > { %s445_s11 = scalar_lea.hbm %s809_s1, 256  ;;  %p446_p4 = scmp.lt.s32.totalorder %s661_s30, %s809_s1 }
  0x1a   : > { %p443_p2 = pnand %p442_p1, %p441_p0  ;;  %p447_p5 = scmp.lt.s32.totalorder %s445_s11, %s440_s8 }
  0x1c   : > { %p444_p3 = pneg %p443_p2  ;;  %p448_p7 = por %p447_p5, %p446_p4 }
  0x1e   : > { %p449_p8 = pnand %p448_p7, %p444_p3 }
  0x20   : > { %452 = shalt.err (!%p449_p8)
}
  0x21   : > { %s453_s19 = scalar_lea.vmem %s669_s5, 128  ;;  %s566_s21 = smov [#allocation4]  }
  0x22   : > { %p454_p10 = scmp.ne.s32.totalorder %s669_s5, %s453_s19  ;;  %s458_s26 = sshll.u32 %s566_s21, 4  ;;  %s459_s26 = int_to_ptr.vmem [resolvable:$false] %s458_s26 }
  0x23   : > { %s460_s27 = scalar_lea.vmem %s459_s26, 256  ;;  %p461_p9 = scmp.lt.s32.totalorder %s669_s5, %s459_s26 }
  0x24   : > { %p456_p0 = pnand %p454_p10, %p442_p1  ;;  %p462_p12 = scmp.lt.s32.totalorder %s460_s27, %s453_s19 }
  0x26   : > { %p457_p2 = pneg %p456_p0  ;;  %p463_p11 = por %p462_p12, %p461_p9 }
  0x28   : > { %p464_p4 = pnand %p463_p11, %p457_p2 }
  0x2a   : > { %467 = shalt.err (!%p464_p4)
}
  0x2b   : > { %s567_s28 = smov 32   ;;  %s568_s29 = smov 2  }
  0x2c   : > { %392 = dma.hbm_to_vmem [thread:$0]  (!%p665_p13), %s661_s30, 128, %s669_s5, %s120_s7, %s567_s28, %s567_s28, %s568_s29  }
  0x2d   : > { %p367_p3 = scmp.ge.s32.totalorder %s564_s14, 1  ;;  %p159_p5 = scmp.lt.s32.totalorder %s564_s14, 3 }
  0x2e   : > { %s364_s4 = sshll.u32 %s654_s25, 2  ;;  %s381_s9 = sshll.u32 %s564_s14, 6 }
  0x2f   : > { %p701_p9 = pnand %p367_p3, %p159_p5  ;;  %s144_s10 = scalar_lea.vmem [#allocation7], %s364_s4 }
  0x30   : > { %s151_s11 = sshll.u32 %s144_s10, 4  ;;  %s709_s19 = scalar_lea.hbm %s810_s2, %s381_s9  ;;  %s711_s11 = int_to_ptr.vmem [resolvable:$true] %s151_s11 }
  0x31   : > { %s141_s30 = scalar_lea.sflag [#allocation8], %s654_s25  ;;  %s468_s5 = scalar_lea.hbm %s709_s19, 64 }
  0x32   : > { %p469_p11 = scmp.ne.s32.totalorder %s709_s19, %s468_s5  ;;  %s473_s26 = scalar_lea.hbm %s810_s2, 128 }
  0x33   : > { %p474_p8 = scmp.lt.s32.totalorder %s709_s19, %s810_s2  ;;  %p475_p10 = scmp.lt.s32.totalorder %s473_s26, %s468_s5 }
  0x34   : > { %p471_p12 = pnand %p469_p11, %p442_p1 }
  0x35   : > { %p476_p0 = por %p475_p10, %p474_p8 }
  0x36   : > { %p472_p7 = pneg %p471_p12 }
  0x38   : > { %p477_p2 = pnand %p476_p0, %p472_p7 }
  0x3a   : > { %480 = shalt.err (!%p477_p2)
}
  0x3b   : > { %s481_s29 = scalar_lea.vmem %s711_s11, 64  ;;  %s569_s4 = smov [#allocation7]  }
  0x3c   : > { %p482_p4 = scmp.ne.s32.totalorder %s711_s11, %s481_s29  ;;  %s486_s9 = sshll.u32 %s569_s4, 4  ;;  %s487_s9 = int_to_ptr.vmem [resolvable:$false] %s486_s9 }
  0x3d   : > { %s488_s10 = scalar_lea.vmem %s487_s9, 128  ;;  %p489_p11 = scmp.lt.s32.totalorder %s711_s11, %s487_s9 }
  0x3e   : > { %p484_p3 = pnand %p482_p4, %p442_p1  ;;  %p490_p12 = scmp.lt.s32.totalorder %s488_s10, %s481_s29 }
  0x40   : > { %p485_p5 = pneg %p484_p3  ;;  %p491_p6 = por %p490_p12, %p489_p11 }
  0x42   : > { %p492_p8 = pnand %p491_p6, %p485_p5 }
  0x44   : > { %495 = shalt.err (!%p492_p8)
}
  0x45   : > { %s570_s16 = smov 16   ;;  %s571_s18 = smov 1  }
  0x46   : > { %395 = dma.hbm_to_vmem [thread:$0]  (!%p665_p13), %s709_s19, 64, %s711_s11, %s141_s30, %s570_s16, %s570_s16, %s571_s18  }
  0x47   : > { %163 = sbr.rel (%p701_p9) target bundleno = 107 (0x6b), region = 28  ;;  %s741_s5 = sand.u32 (!%p701_p9), 1, %s556_s13  }
  0x48   : > { %s368_s7 = sshll.u32 (!%p701_p9), %s741_s5, 3  ;;  %s166_s21 = scalar_lea.sflag (!%p701_p9), [#allocation5], %s741_s5 }
  0x49   : > { %s169_s26 = scalar_lea.vmem (!%p701_p9), [#allocation4], %s368_s7  ;;  %p820_p6 = scmp.ne.s32.totalorder (!%p701_p9), %s815_s22, 0 }
  0x4c   : > { %539 = dma.done.wait (%p820_p6), %s166_s21, 128  }
  0x4d   : > { %541 = vsyncadd (%p820_p6), %s166_s21, 4294967168  ;;  %s369_s25 = sshll.u32 %s741_s5, 2  ;;  %s175_s6 = scalar_lea.sflag [#allocation8], %s741_s5 }
  0x4e   : > { %s178_s8 = scalar_lea.vmem [#allocation7], %s369_s25 }
  0x4f   : > { %543 = dma.done.wait (%p820_p6), %s175_s6, 64  }
  0x50   : > { %545 = vsyncadd (%p820_p6), %s175_s6, 4294967232  ;;  %vm243_vm0 = vcmask 254976   ;;  %s203_s11 = scalar_lea.vmem [#allocation9], %s368_s7  ;;  %s382_s30 = sshll.u32 %s616_s15, 7  ;;  %v207_v0 = vld [vmem:[%s169_s26] sm:$0x3] }
  0x51   : > { %s262_s19 = sshll.u32 %s203_s11, 4  ;;  %v371_v1 = vld [vmem:[%s178_s8] ss:$0 sm:$0xff]  ;;  %v208_v2 = vld [vmem:[%s169_s26 + $0x2] sm:$0x3]  ;;  %s761_s15 = scalar_lea.hbm %s811_s3, %s382_s30  ;;  %s756_s19 = int_to_ptr.vmem [resolvable:$true] %s262_s19 }
  0x52   : > { %v239_v3 = vadd.f32 %v371_v1, %v207_v0  ;;  %v372_v4 = vld [vmem:[%s178_s8 + $0x1] ss:$0 sm:$0xff]  ;;  %v209_v5 = vld [vmem:[%s169_s26 + $0x4] sm:$0x3]  ;;  %v373_v6 = vld [vmem:[%s178_s8 + $0x2] ss:$0 sm:$0xff] }
  0x53   : > { %v240_v7 = vadd.f32 %v372_v4, %v208_v2  ;;  %v241_v8 = vadd.f32 %v373_v6, %v209_v5  ;;  %v210_v9 = vld [vmem:[%s169_s26 + $0x6] sm:$0x3]  ;;  %v374_v10 = vld [vmem:[%s178_s8 + $0x3] ss:$0 sm:$0xff]  ;;  %s249_s28 = scalar_lea.sflag [#allocation6], %s741_s5  ;;  %s496_s29 = scalar_lea.vmem %s756_s19, 128 }
  0x54   : > { %244 = vst.msk [vmem:[%s203_s11] sm:$0x3] %vm243_vm0, %v239_v3  ;;  %v242_v11 = vadd.f32 %v374_v10, %v210_v9  ;;  %p497_p13 = scmp.ne.s32.totalorder %s756_s19, %s496_s29  ;;  %p821_p1 = scmp.ne.s32.totalorder %s816_s23, 0 }
  0x55   : > { %245 = vst.msk [vmem:[%s203_s11 + $0x2] sm:$0x3] %vm243_vm0, %v240_v7  ;;  %246 = vst.msk [vmem:[%s203_s11 + $0x4] sm:$0x3] %vm243_vm0, %v241_v8  ;;  %s572_s4 = smov [#allocation9]  }
  0x56   : > { %247 = vst.msk [vmem:[%s203_s11 + $0x6] sm:$0x3] %vm243_vm0, %v242_v11  ;;  %p498_p9 = pnand %p497_p13, %p821_p1  ;;  %s500_s9 = sshll.u32 %s572_s4, 4  ;;  %s501_s9 = int_to_ptr.vmem [resolvable:$false] %s500_s9 }
  0x57   : > { %s502_s10 = scalar_lea.vmem %s501_s9, 256  ;;  %p503_p10 = scmp.lt.s32.totalorder %s756_s19, %s501_s9 }
  0x58   : > { %p499_p7 = pneg %p498_p9  ;;  %p504_p0 = scmp.lt.s32.totalorder %s502_s10, %s496_s29 }
  0x5a   : > { %p505_p2 = por %p504_p0, %p503_p10 }
  0x5c   : > { %p506_p4 = pnand %p505_p2, %p499_p7 }
  0x5e   : > { %509 = shalt.err (!%p506_p4)
}
  0x5f   : > { %s510_s16 = scalar_lea.hbm %s761_s15, 128  ;;  %s514_s21 = scalar_lea.hbm %s811_s3, 256 }
  0x60   : > { %p511_p3 = scmp.ne.s32.totalorder %s761_s15, %s510_s16  ;;  %p515_p12 = scmp.lt.s32.totalorder %s761_s15, %s811_s3 }
  0x61   : > { %p516_p8 = scmp.lt.s32.totalorder %s514_s21, %s510_s16 }
  0x62   : > { %p512_p5 = pnand %p511_p3, %p821_p1 }
  0x63   : > { %p517_p6 = por %p516_p8, %p515_p12 }
  0x64   : > { %p513_p11 = pneg %p512_p5 }
  0x66   : > { %p518_p13 = pnand %p517_p6, %p513_p11 }
  0x68   : > { %521 = shalt.err (!%p518_p13)
}
  0x69   : > { %s573_s6 = smov 32   ;;  %s574_s8 = smov 2  }
  0x6a   : > { %387 = dma.vmem_to_hbm [thread:$0]  (%p821_p1), %s756_s19, 128, %s761_s15, %s249_s28, %s573_s6, %s573_s6, %s574_s8  }
  0x6b PF: > { %s277_s11 = sand.u32 1, %s552_s12   ;;  %p822_p9 = scmp.ne.s32.totalorder %s817_s24, 0 }
  0x6c   : > { %p823_p7 = scmp.ge.s32.totalorder %s564_s14, 2  ;;  %s278_s30 = scalar_lea.sflag [#allocation6], %s277_s11 }
  0x6e   : > { %p397_p10 = pnand %p823_p7, %p822_p9 }
  0x70   : > { %p398_p0 = pneg %p397_p10 }
  0x72   : > { %547 = dma.done.wait (%p398_p0), %s278_s30, 128  }
  0x73   : > { %549 = vsyncadd (%p398_p0), %s278_s30, 4294967168  ;;  %p20_p2 = scmp.ge.s32.totalorder %s620_s17, 4   ;;  %s824_s12 = smov %s556_s13 }
  0x74   : > { %s825_s13 = smov %s560_s0  ;;  %s826_s0 = smov %s632_s20 }
  0x75   : > { %s827_s14 = smov %s620_s17  ;;  %22 = sbr.rel (!%p20_p2) target bundleno = 7 (0x7), region = 86 }
  0x7a   :  { %283 = vsyncpa [#allocation5], 1 }
  0x7b   :  { %285 = vsyncpa [#allocation5 + $0x1], 1 }
  0x7c   :  { %286 = vsyncpa [#allocation8], 1 }
  0x7d   :  { %288 = vsyncpa [#allocation8 + $0x1], 1 }
  0x7e   :  { %289 = vsyncpa [#allocation6], 1 }
  0x7f   :  { %291 = vsyncpa [#allocation6 + $0x1], 1 }

</bundles_post_ra>
